<compile_context>
chip_gen: v7x
topology: tpu7x:2x2x1
jax: 0.10.0
libtpu: 0.0.40
codegen_flags: <defaults>
</compile_context>

<pallas_src>
import jax
import jax.numpy as jnp
from jax.experimental import pallas as pl
from jax.experimental.pallas import tpu as pltpu


LANE = 128                   # vreg lane width; lane-axis tiles must be a
                             # multiple of this (or the full dim).
MAX_TILE_B = 4096            # batch (lane-axis) tile cap.
MAX_TILE_N = 8               # action-set (sublane-axis) tile cap.
MATMUL_DTYPE = jnp.float32   # set to jnp.bfloat16 on v6e/v7x for HBM-BW wins
                             # (loosen the allclose tolerances if you do).


# ------------------------- Pallas kernels (hot path) -------------------------

def _mlp_tail(pre1, b1_ref, w2t_ref, b2_ref, w3t_ref, b3_ref, cd):
    """(H1, tb) pre-activations -> (1, tb) Q row.  f32 bias/ReLU, cd matmuls."""
    h = jnp.maximum(pre1 + b1_ref[...], 0.0)                            # ReLU
    h = jnp.dot(w2t_ref[...], h.astype(cd),
                preferred_element_type=jnp.float32) + b2_ref[...]       # (H2, tb)
    h = jnp.maximum(h, 0.0)                                             # ReLU
    q = jnp.dot(w3t_ref[...], h.astype(cd),
                preferred_element_type=jnp.float32) + b3_ref[...]       # (1, tb)
    return q


def _make_split_kernel(tile_n, cd):
    """x @ W1 == s @ W1_s + a @ W1_a, computed transposed (batch on lanes)."""
    def kernel(s_ref, a_ref, w1st_ref, w1at_ref, b1_ref, w2t_ref, b2_ref,
               w3t_ref, b3_ref, o_ref):
        # s_ref: (obs, tb); a_ref: (tile_n, act, tb); o_ref: (tile_n, tb).
        # The s part of the first matmul is shared by all tile_n action rows.
        pre1_s = jnp.dot(w1st_ref[...], s_ref[...].astype(cd),
                         preferred_element_type=jnp.float32)            # (H1, tb)
        rows = []
        for n in range(tile_n):                       # small, static unroll
            pre1 = pre1_s + jnp.dot(w1at_ref[...], a_ref[n].astype(cd),
                                    preferred_element_type=jnp.float32)
            rows.append(_mlp_tail(pre1, b1_ref, w2t_ref, b2_ref,
                                  w3t_ref, b3_ref, cd))
        # Single dense (tile_n, tb) store: lane-dense, unmasked vst.
        o_ref[...] = jnp.concatenate(rows, axis=0).astype(o_ref.dtype)
    return kernel


def _make_noact_kernel(cd):
    def kernel(s_ref, w1t_ref, b1_ref, w2t_ref, b2_ref, w3t_ref, b3_ref, o_ref):
        pre1 = jnp.dot(w1t_ref[...], s_ref[...].astype(cd),
                       preferred_element_type=jnp.float32)              # (H1, tb)
        o_ref[...] = _mlp_tail(pre1, b1_ref, w2t_ref, b2_ref,
                               w3t_ref, b3_ref, cd).astype(o_ref.dtype)
    return kernel


# ----------------------------- tiling helpers --------------------------------

def _round_up(x, m):
    return (x + m - 1) // m * m


def _pick_tile_b(B):
    """Lane-axis batch tile: a multiple of 128, or the full batch dim."""
    if B > MAX_TILE_B:
        return MAX_TILE_B                      # multiple of 128
    if B >= 2 * LANE:
        # Split into >= 2 lane-aligned tiles so v7x can use both TensorCores
        # (no-op on v5e/v6e, which have a single TC).
        return min(_round_up(pl.cdiv(B, 2), LANE), MAX_TILE_B)
    return B                                   # single block == full dim


# ----------------------------- pallas_call wrapper ---------------------------

def _run_mlp(s_t, a_t, params):
    """s_t: (obs_dim, B);  a_t: (N, act_dim, B) or None.

    Returns (N, B) f32 if a_t is given, else (1, B) f32.  Batch is the last
    (lane) axis everywhere, so all blocks and the output stores are lane-dense.
    """
    w1, b1, w2, b2, w3, b3 = params
    obs_dim, B = s_t.shape
    H1 = w1.shape[1]
    H2 = w2.shape[1]
    assert w3.shape[1] == 1
    # TODO(synk): output_size > 1 would need a dense final matmul; only the
    # module default (output_size == 1) is kernelized.

    cd = MATMUL_DTYPE
    in_isz = jnp.dtype(s_t.dtype).itemsize
    w_isz = jnp.dtype(cd).itemsize

    # Weight-side transposes / casts are tiny, one-time wrapper ops.  The
    # batch-proportional operands (s_t, a_t) are passed through untouched so
    # no extra HBM round-trip is introduced.
    b1c = b1.reshape(H1, 1).astype(jnp.float32)
    b2c = b2.reshape(H2, 1).astype(jnp.float32)
    b3c = b3.reshape(1, 1).astype(jnp.float32)
    w2t = w2.T.astype(cd)                        # (H2, H1)
    w3t = w3.T.astype(jnp.float32)               # (1, H2) final layer

    tile_b = _pick_tile_b(B)
    nb = pl.cdiv(B, tile_b)                      # partial last block: padded
                                                 # reads / clipped writes.

    if a_t is not None:
        N, act_dim, _ = a_t.shape
        a_isz = jnp.dtype(a_t.dtype).itemsize
        tile_n = N if N <= MAX_TILE_N else MAX_TILE_N
        nn = pl.cdiv(N, tile_n)
        w1st = w1[:obs_dim].T.astype(cd)         # (H1, obs)
        w1at = w1[obs_dim:].T.astype(cd)         # (H1, act)
        # Grid: batch tiles outer, action-set tiles inner, so the s tile and
        # every weight keep a constant block index over the inner axis and are
        # DMA'd once per batch tile; only a and q move per step.
        grid = (nb, nn)
        operands = (s_t, a_t, w1st, w1at, b1c, w2t, b2c, w3t, b3c)
        in_specs = [
            pl.BlockSpec((obs_dim, tile_b), lambda i, n: (0, i)),
            pl.BlockSpec((tile_n, act_dim, tile_b), lambda i, n: (n, 0, i)),
            pl.BlockSpec((H1, obs_dim), lambda i, n: (0, 0)),
            pl.BlockSpec((H1, act_dim), lambda i, n: (0, 0)),
            pl.BlockSpec((H1, 1), lambda i, n: (0, 0)),
            pl.BlockSpec((H2, H1), lambda i, n: (0, 0)),
            pl.BlockSpec((H2, 1), lambda i, n: (0, 0)),
            pl.BlockSpec((1, H2), lambda i, n: (0, 0)),
            pl.BlockSpec((1, 1), lambda i, n: (0, 0)),
        ]
        out_shape = jax.ShapeDtypeStruct((N, B), jnp.float32)
        out_specs = pl.BlockSpec((tile_n, tile_b), lambda i, n: (n, i))
        dim_sem = ("parallel", "parallel")
        kernel = _make_split_kernel(tile_n, cd)
        rows = N * B
        flops = 2 * (B * obs_dim * H1 + rows * (act_dim * H1 + H1 * H2 + H2))
        bytes_accessed = (B * obs_dim * in_isz + rows * act_dim * a_isz
                          + rows * 4
                          + ((obs_dim + act_dim) * H1 + H1 * H2) * w_isz
                          + 4 * (H1 + 2 * H2 + 1))
        step_bytes = 2 * (obs_dim * tile_b * in_isz
                          + tile_n * act_dim * tile_b * a_isz
                          + tile_n * tile_b * 4)
    else:
        grid = (nb,)
        w1t = w1.T.astype(cd)                    # (H1, obs)
        operands = (s_t, w1t, b1c, w2t, b2c, w3t, b3c)
        in_specs = [
            pl.BlockSpec((obs_dim, tile_b), lambda i: (0, i)),
            pl.BlockSpec((H1, obs_dim), lambda i: (0, 0)),
            pl.BlockSpec((H1, 1), lambda i: (0, 0)),
            pl.BlockSpec((H2, H1), lambda i: (0, 0)),
            pl.BlockSpec((H2, 1), lambda i: (0, 0)),
            pl.BlockSpec((1, H2), lambda i: (0, 0)),
            pl.BlockSpec((1, 1), lambda i: (0, 0)),
        ]
        out_shape = jax.ShapeDtypeStruct((1, B), jnp.float32)
        out_specs = pl.BlockSpec((1, tile_b), lambda i: (0, i))
        dim_sem = ("parallel",)
        kernel = _make_noact_kernel(cd)
        rows = B
        flops = 2 * rows * (obs_dim * H1 + H1 * H2 + H2)
        bytes_accessed = (rows * obs_dim * in_isz + rows * 4
                          + (obs_dim * H1 + H1 * H2) * w_isz
                          + 4 * (H1 + 2 * H2 + 1))
        step_bytes = 2 * (obs_dim * tile_b * in_isz + tile_b * 4)

    # Explicit scoped-VMEM budget: double-buffered batch tiles + f32
    # intermediates + (tiny) weights, with 4x headroom.  Keeps larger tiles
    # legal on v5e's 16 MiB / v7x's 32 MiB defaults; the 48 MiB cap stays
    # inside v7x's 64 MiB physical VMEM.
    step_bytes += 6 * (H1 + H2) * tile_b * 4
    step_bytes += 4 * ((obs_dim + 2) * H1 + (H1 + 3) * H2 + 2) * w_isz
    vmem_limit = int(min(max(4 * step_bytes, 32 << 20), 48 << 20))

    return pl.pallas_call(
        kernel,
        out_shape=out_shape,
        grid=grid,
        in_specs=in_specs,
        out_specs=out_specs,
        compiler_params=pltpu.CompilerParams(
            dimension_semantics=dim_sem,
            vmem_limit_bytes=vmem_limit),
        cost_estimate=pl.CostEstimate(flops=int(flops), transcendentals=0,
                                      bytes_accessed=int(bytes_accessed)),
    )(*operands)


# ----------------------------- CriticFC forward ------------------------------

def critic_fc_forward(params, s, a=None, act_dim=0):
    """Mirrors CriticFC.forward semantics exactly (output_size == 1)."""
    if act_dim:
        if a.ndim > s.ndim:
            # a: (n, b, act), s: (b, obs).  Torch broadcasts s and concats;
            # here the kernel splits the first matmul so s is never expanded.
            # Transposes below are cheap layout plumbing to make the kernel's
            # batch axis lane-dense.
            s_t = s.T                                  # (obs, b)
            a_t = jnp.swapaxes(a, 1, 2)                # (n, act, b)
            return _run_mlp(s_t, a_t, params)          # (n, b)
        else:
            lead = s.shape[:-1]
            s2 = s.reshape(-1, s.shape[-1])
            a2 = a.reshape(-1, a.shape[-1])
            q = _run_mlp(s2.T, a2.T[None], params)     # (1, B)
            return q.reshape(*lead)
    else:
        lead = s.shape[:-1]
        s2 = s.reshape(-1, s.shape[-1])
        q = _run_mlp(s2.T, None, params)               # (1, B)
        return q.reshape(*lead)


# -------------------------- deterministic parameters --------------------------

def init_params(key, obs_dim, act_dim, hidden_sizes, output_size=1):
    sizes = [obs_dim + act_dim] + list(hidden_sizes) + [output_size]
    params = []
    for j in range(len(sizes) - 1):
        key, kw, kb = jax.random.split(key, 3)
        bound = 1.0 / jnp.sqrt(sizes[j])          # torch nn.Linear default init
        w = jax.random.uniform(kw, (sizes[j], sizes[j + 1]),
                               minval=-bound, maxval=bound, dtype=jnp.float32)
        b = jax.random.uniform(kb, (1, sizes[j + 1]),
                               minval=-bound, maxval=bound, dtype=jnp.float32)
        params += [w, b]
    return tuple(params)


# ------------------------------------ main ------------------------------------

if __name__ == "__main__":
    obs_dim, act_dim = 12, 4
    hidden_sizes = (32, 32)
    B, N = 8, 3

    key = jax.random.PRNGKey(0)
    kp, kp0, ks, ka, ka3 = jax.random.split(key, 5)
    params = init_params(kp, obs_dim, act_dim, hidden_sizes)
    params_noact = init_params(kp0, obs_dim, 0, hidden_sizes)

    s = jax.random.normal(ks, (B, obs_dim), dtype=jnp.float32)
    a = jax.random.normal(ka, (B, act_dim), dtype=jnp.float32)
    a3 = jax.random.normal(ka3, (N, B, act_dim), dtype=jnp.float32)

    # 2-D path: s (B, obs), a (B, act) -> q (B,)
    q2 = jax.block_until_ready(critic_fc_forward(params, s, a, act_dim=act_dim))
    assert q2.shape == (B,), q2.shape

    # 3-D broadcast path: a (N, B, act) -> q (N, B)
    q3 = jax.block_until_ready(critic_fc_forward(params, s, a3, act_dim=act_dim))
    assert q3.shape == (N, B), q3.shape

    # No-action path: s (B, obs) -> q (B,)
    q0 = jax.block_until_ready(critic_fc_forward(params_noact, s, None, act_dim=0))
    assert q0.shape == (B,), q0.shape

    # Pure-JAX reference (torch-equivalent concat path) for correctness.
    def ref_mlp(x, p):
        w1, b1, w2, b2, w3, b3 = p
        h = jnp.maximum(x @ w1 + b1, 0.0)
        h = jnp.maximum(h @ w2 + b2, 0.0)
        return h @ w3 + b3

    x2 = jnp.concatenate([s, a], axis=-1)
    q2_ref = jnp.squeeze(ref_mlp(x2, params), -1)
    assert jnp.allclose(q2, q2_ref, atol=1e-4, rtol=1e-4)

    x3 = jnp.concatenate(
        [jnp.broadcast_to(s[None], (N, B, obs_dim)), a3], axis=-1
    ).reshape(N * B, -1)
    q3_ref = jnp.squeeze(ref_mlp(x3, params), -1).reshape(N, B)
    assert jnp.allclose(q3, q3_ref, atol=1e-4, rtol=1e-4)

    q0_ref = jnp.squeeze(ref_mlp(s, params_noact), -1)
    assert jnp.allclose(q0, q0_ref, atol=1e-4, rtol=1e-4)

    print("KERNEL_OK")
</pallas_src>

<mosaic_0001>
module attributes {stable_mosaic.version = 11 : i64} {
  func.func @kernel(%arg0: i32, %arg1: i32, %arg2: memref<12x8xf32, #tpu.memory_space<vmem>>, %arg3: memref<1x4x8xf32, #tpu.memory_space<vmem>>, %arg4: memref<32x12xf32, #tpu.memory_space<vmem>>, %arg5: memref<32x4xf32, #tpu.memory_space<vmem>>, %arg6: memref<32x1xf32, #tpu.memory_space<vmem>>, %arg7: memref<32x32xf32, #tpu.memory_space<vmem>>, %arg8: memref<32x1xf32, #tpu.memory_space<vmem>>, %arg9: memref<1x32xf32, #tpu.memory_space<vmem>>, %arg10: memref<1x1xf32, #tpu.memory_space<vmem>>, %arg11: memref<1x8xf32, #tpu.memory_space<vmem>>) attributes {dimension_semantics = [#tpu.dimension_semantics<parallel>, #tpu.dimension_semantics<parallel>], iteration_bounds = array<i64: 1, 1>, scalar_prefetch = 0 : i64, scratch_operands = 0 : i64, tpu.core_type = #tpu.core_type<tc>, window_params = [{transform_indices = @transform_0, window_bounds = array<i64: 12, 8>}, {transform_indices = @transform_1, window_bounds = array<i64: 1, 4, 8>}, {pipeline_mode = #tpu.pipeline_mode<synchronous>, transform_indices = @transform_2, window_bounds = array<i64: 32, 12>}, {pipeline_mode = #tpu.pipeline_mode<synchronous>, transform_indices = @transform_3, window_bounds = array<i64: 32, 4>}, {pipeline_mode = #tpu.pipeline_mode<synchronous>, transform_indices = @transform_4, window_bounds = array<i64: 32, 1>}, {pipeline_mode = #tpu.pipeline_mode<synchronous>, transform_indices = @transform_5, window_bounds = array<i64: 32, 32>}, {pipeline_mode = #tpu.pipeline_mode<synchronous>, transform_indices = @transform_6, window_bounds = array<i64: 32, 1>}, {pipeline_mode = #tpu.pipeline_mode<synchronous>, transform_indices = @transform_7, window_bounds = array<i64: 1, 32>}, {pipeline_mode = #tpu.pipeline_mode<synchronous>, transform_indices = @transform_8, window_bounds = array<i64: 1, 1>}, {transform_indices = @transform_9, window_bounds = array<i64: 1, 8>}]} {
    %c0 = arith.constant 0 : index
    %c0_0 = arith.constant 0 : index
    %0 = vector.load %arg4[%c0, %c0_0] : memref<32x12xf32, #tpu.memory_space<vmem>>, vector<32x12xf32>
    %c0_1 = arith.constant 0 : index
    %c0_2 = arith.constant 0 : index
    %1 = vector.load %arg2[%c0_1, %c0_2] : memref<12x8xf32, #tpu.memory_space<vmem>>, vector<12x8xf32>
    %cst = arith.constant dense<0.000000e+00> : vector<32x8xf32>
    %2 = tpu.matmul %0, %1, %cst {dimension_numbers = #tpu.dot_dimension_numbers<[1], [0], [0], [1], [0, 0, 1, 1], [], []>} : vector<32x12xf32>, vector<12x8xf32>, vector<32x8xf32> -> vector<32x8xf32>
    %c0_3 = arith.constant 0 : index
    %c0_4 = arith.constant 0 : index
    %3 = vector.load %arg5[%c0_3, %c0_4] : memref<32x4xf32, #tpu.memory_space<vmem>>, vector<32x4xf32>
    %c0_5 = arith.constant 0 : index
    %c0_6 = arith.constant 0 : index
    %c0_7 = arith.constant 0 : index
    %4 = vector.load %arg3[%c0_5, %c0_6, %c0_7] : memref<1x4x8xf32, #tpu.memory_space<vmem>>, vector<1x4x8xf32>
    %5 = vector.shape_cast %4 : vector<1x4x8xf32> to vector<4x8xf32>
    %cst_8 = arith.constant dense<0.000000e+00> : vector<32x8xf32>
    %6 = tpu.matmul %3, %5, %cst_8 {dimension_numbers = #tpu.dot_dimension_numbers<[1], [0], [0], [1], [0, 0, 1, 1], [], []>} : vector<32x4xf32>, vector<4x8xf32>, vector<32x8xf32> -> vector<32x8xf32>
    %7 = arith.addf %2, %6 : vector<32x8xf32>
    %c0_9 = arith.constant 0 : index
    %c0_10 = arith.constant 0 : index
    %8 = vector.load %arg6[%c0_9, %c0_10] : memref<32x1xf32, #tpu.memory_space<vmem>>, vector<32x1xf32>
    %9 = vector.broadcast %8 : vector<32x1xf32> to vector<32x8xf32>
    %10 = arith.addf %7, %9 : vector<32x8xf32>
    %cst_11 = arith.constant 0.000000e+00 : f32
    %11 = vector.broadcast %cst_11 : f32 to vector<32x8xf32>
    %12 = arith.maximumf %10, %11 : vector<32x8xf32>
    %c0_12 = arith.constant 0 : index
    %c0_13 = arith.constant 0 : index
    %13 = vector.load %arg7[%c0_12, %c0_13] : memref<32x32xf32, #tpu.memory_space<vmem>>, vector<32x32xf32>
    %cst_14 = arith.constant dense<0.000000e+00> : vector<32x8xf32>
    %14 = tpu.matmul %13, %12, %cst_14 {dimension_numbers = #tpu.dot_dimension_numbers<[1], [0], [0], [1], [0, 0, 1, 1], [], []>} : vector<32x32xf32>, vector<32x8xf32>, vector<32x8xf32> -> vector<32x8xf32>
    %c0_15 = arith.constant 0 : index
    %c0_16 = arith.constant 0 : index
    %15 = vector.load %arg8[%c0_15, %c0_16] : memref<32x1xf32, #tpu.memory_space<vmem>>, vector<32x1xf32>
    %16 = vector.broadcast %15 : vector<32x1xf32> to vector<32x8xf32>
    %17 = arith.addf %14, %16 : vector<32x8xf32>
    %cst_17 = arith.constant 0.000000e+00 : f32
    %18 = vector.broadcast %cst_17 : f32 to vector<32x8xf32>
    %19 = arith.maximumf %17, %18 : vector<32x8xf32>
    %c0_18 = arith.constant 0 : index
    %c0_19 = arith.constant 0 : index
    %20 = vector.load %arg9[%c0_18, %c0_19] : memref<1x32xf32, #tpu.memory_space<vmem>>, vector<1x32xf32>
    %cst_20 = arith.constant dense<0.000000e+00> : vector<1x8xf32>
    %21 = tpu.matmul %20, %19, %cst_20 {dimension_numbers = #tpu.dot_dimension_numbers<[1], [0], [0], [1], [0, 0, 1, 1], [], []>} : vector<1x32xf32>, vector<32x8xf32>, vector<1x8xf32> -> vector<1x8xf32>
    %c0_21 = arith.constant 0 : index
    %c0_22 = arith.constant 0 : index
    %22 = vector.load %arg10[%c0_21, %c0_22] : memref<1x1xf32, #tpu.memory_space<vmem>>, vector<1x1xf32>
    %23 = vector.broadcast %22 : vector<1x1xf32> to vector<1x8xf32>
    %24 = arith.addf %21, %23 : vector<1x8xf32>
    %c0_23 = arith.constant 0 : index
    %c0_24 = arith.constant 0 : index
    %25 = vector.load %arg11[%c0_23, %c0_24] : memref<1x8xf32, #tpu.memory_space<vmem>>, vector<1x8xf32>
    tpu.vector_store %arg11[%c0_23, %c0_24], %24 {strides = array<i32>} : memref<1x8xf32, #tpu.memory_space<vmem>>, vector<1x8xf32>,
    return
  }
  func.func @transform_0(%arg0: i32, %arg1: i32) -> (i32, i32) {
    %c0_i32 = arith.constant 0 : i32
    %c0_i32_0 = arith.constant 0 : i32
    return %c0_i32, %arg0 : i32, i32
  }
  func.func @transform_1(%arg0: i32, %arg1: i32) -> (i32, i32, i32) {
    %c0_i32 = arith.constant 0 : i32
    %c0_i32_0 = arith.constant 0 : i32
    return %arg1, %c0_i32, %arg0 : i32, i32, i32
  }
  func.func @transform_2(%arg0: i32, %arg1: i32) -> (i32, i32) {
    %c0_i32 = arith.constant 0 : i32
    %c0_i32_0 = arith.constant 0 : i32
    %c0_i32_1 = arith.constant 0 : i32
    return %c0_i32, %c0_i32_0 : i32, i32
  }
  func.func @transform_3(%arg0: i32, %arg1: i32) -> (i32, i32) {
    %c0_i32 = arith.constant 0 : i32
    %c0_i32_0 = arith.constant 0 : i32
    %c0_i32_1 = arith.constant 0 : i32
    return %c0_i32, %c0_i32_0 : i32, i32
  }
  func.func @transform_4(%arg0: i32, %arg1: i32) -> (i32, i32) {
    %c0_i32 = arith.constant 0 : i32
    %c0_i32_0 = arith.constant 0 : i32
    %c0_i32_1 = arith.constant 0 : i32
    return %c0_i32, %c0_i32_0 : i32, i32
  }
  func.func @transform_5(%arg0: i32, %arg1: i32) -> (i32, i32) {
    %c0_i32 = arith.constant 0 : i32
    %c0_i32_0 = arith.constant 0 : i32
    %c0_i32_1 = arith.constant 0 : i32
    return %c0_i32, %c0_i32_0 : i32, i32
  }
  func.func @transform_6(%arg0: i32, %arg1: i32) -> (i32, i32) {
    %c0_i32 = arith.constant 0 : i32
    %c0_i32_0 = arith.constant 0 : i32
    %c0_i32_1 = arith.constant 0 : i32
    return %c0_i32, %c0_i32_0 : i32, i32
  }
  func.func @transform_7(%arg0: i32, %arg1: i32) -> (i32, i32) {
    %c0_i32 = arith.constant 0 : i32
    %c0_i32_0 = arith.constant 0 : i32
    %c0_i32_1 = arith.constant 0 : i32
    return %c0_i32, %c0_i32_0 : i32, i32
  }
  func.func @transform_8(%arg0: i32, %arg1: i32) -> (i32, i32) {
    %c0_i32 = arith.constant 0 : i32
    %c0_i32_0 = arith.constant 0 : i32
    %c0_i32_1 = arith.constant 0 : i32
    return %c0_i32, %c0_i32_0 : i32, i32
  }
  func.func @transform_9(%arg0: i32, %arg1: i32) -> (i32, i32) {
    %c0_i32 = arith.constant 0 : i32
    return %arg1, %arg0 : i32, i32
  }
}

</mosaic_0001>

<bundles_post_ra>
// kernel: tpu_custom_call.1
= control target key start
LH: loop header
LB: loop body
LE: loop exit
PB: predicated region body
PF: predicated region fallthrough
CT: control target
= control target key end

     0   :  { %s805_s0 = inlined_call_operand.vmem [shape: f32[12,8], index: 0, kind: input, shape index: {}]   ;;  %s806_s1 = inlined_call_operand.vmem [shape: f32[1,4,8], index: 1, kind: input, shape index: {}]   ;;  %s807_s2 = inlined_call_operand.vmem [shape: f32[32,12], index: 2, kind: input, shape index: {}]   ;;  %s808_s3 = inlined_call_operand.vmem [shape: f32[32,4], index: 3, kind: input, shape index: {}]   ;;  %s809_s4 = inlined_call_operand.vmem [shape: f32[32,1], index: 4, kind: input, shape index: {}]   ;;  %s810_s5 = inlined_call_operand.vmem [shape: f32[32,32], index: 5, kind: input, shape index: {}]   ;;  %s811_s6 = inlined_call_operand.vmem [shape: f32[32,1], index: 6, kind: input, shape index: {}]   ;;  %s812_s7 = inlined_call_operand.vmem [shape: f32[1,32], index: 7, kind: input, shape index: {}]   ;;  %s813_s8 = inlined_call_operand.<no memory space> [shape: f32[1,1], index: 8, kind: input, shape index: {}]   ;;  %s814_s9 = inlined_call_operand.hbm [shape: f32[1,8], index: 9, kind: output, shape index: {}]  }
   0x1   :  { %v14_v0 = vstv %s813_s8 }
   0x2   :  { %15 = vst [vmem:[#allocation2] sm:$0x1] %v14_v0 }
   0x3   :  { %v45_v1 = vld [vmem:[%s806_s1] sm:$0xf]  ;;  %vm59_vm0 = vcmask 1043456   ;;  %vm46_vm1 = vcmask 31744   ;;  %v42_v3 = vld [vmem:[%s808_s3 + $0x8] sm:$0xff]  ;;  %v43_v6 = vld [vmem:[%s808_s3 + $0x10] sm:$0xff] }
   0x4   :  { %v41_v2 = vld [vmem:[%s808_s3] sm:$0xff]  ;;  %550 = vmatprep.subr.msk.mxu0 %vm59_vm0, %v45_v1  ;;  %v40_v5 = vld [vmem:[%s805_s0 + $0x8] sm:$0xf]  ;;  %vm649_vm2 = vmmov 1   ;;  %v650_v8 = vmov 0   ;;  %v44_v9 = vld [vmem:[%s808_s3 + $0x18] sm:$0xff] }
   0x5   :  { %552 = vmatprep.mubr.msk.f32.mxu0 %vm46_vm1, %v41_v2  ;;  %v39_v4 = vld [vmem:[%s805_s0] sm:$0xff]  ;;  %551 = vmatpush3.msk.msra.mxu0 %vm59_vm0, %v45_v1  ;;  %vm594_vm3 = vmpackc.low %vm59_vm0, %vm649_vm2  ;;  %v251_v11 = vld [vmem:[%s809_s4 + $0x10] sm:$0xff]  ;;  %vm148_vm4 = vcmask 97280  }
   0x6   :  { %v593_v7 = vpack.c.bf16 %v40_v5, %v39_v4  ;;  %553 = vmatmul.mubr.msk.f32.vlgmr.msra.gmra.mrb[0].mxu0 %vm46_vm1, %v42_v3  ;;  %623 = vset.pattern.permute.xlu0 %v650_v8  ;;  %v249_v10 = vld [vmem:[%s809_s4] sm:$0xff]  ;;  %v250_v13 = vld [vmem:[%s809_s4 + $0x8] sm:$0xff] }
   0x7   :  { %555 = vmatprep.mubr.msk.f32.mxu0 %vm46_vm1, %v43_v6  ;;  %v35_v12 = vld [vmem:[%s807_s2] sm:$0xff]  ;;  %255 = vperm.xlu0 %623, %v249_v10  }
   0x8   :  { %595 = vmatprep.subr.msk.bf16.mxu0 %vm594_vm3, %v593_v7  ;;  %624 = vset.pattern.permute.xlu1 %v650_v8 }
   0x9   :  { %598 = vmatpush3.bf16.msk.msra.mxu0 %vm594_vm3, %v593_v7  ;;  %265 = vperm.xlu1 %624, %v251_v11  }
   0xa   :  { %556 = vmatmul.mubr.msk.f32.gmra.mrb[2].mxu0 %vm46_vm1, %v44_v9 }
   0xb   :  { %16 = vsyncpa [#allocation4], 0  ;;  %562 = vmatprep.mubr.msk.f32.mxu0 %vm148_vm4, %v35_v12  ;;  %v36_v14 = vld [vmem:[%s807_s2 + $0x8] sm:$0xff]  ;;  %v252_v15 = vld [vmem:[%s809_s4 + $0x18] sm:$0xff]  ;;  %260 = vperm.xlu0 %623, %v250_v13   ;;  %vm309_vm5 = vcmask 261120   ;;  %v651_v45 = vmov 0.0|0.0   ;;  %v418_v2 = vlaneseq }
   0xc   :  { %v37_v16 = vld [vmem:[%s807_s2 + $0x10] sm:$0xff]  ;;  %v285_v17 = vld [vmem:[%s811_s6] sm:$0xff]  ;;  %v38_v18 = vld [vmem:[%s807_s2 + $0x18] sm:$0xff]  ;;  %vm652_vm6 = vmmov 0   ;;  %v653_v46 = vmov 0.0   ;;  %s654_s27 = smov [#allocation3]  }
   0xd   :  { %270 = vperm.xlu1 %624, %v252_v15   ;;  %v286_v19 = vld [vmem:[%s811_s6 + $0x8] sm:$0xff]  ;;  %v287_v20 = vld [vmem:[%s811_s6 + $0x10] sm:$0xff]  ;;  %v288_v21 = vld [vmem:[%s811_s6 + $0x18] sm:$0xff]  ;;  %v419_v3 = vshrl.u32 %v418_v2, 7  ;;  %s503_s28 = sshll.u32 %s654_s27, 4  ;;  %vm495_vm7 = vcmask 57344   ;;  %s504_s28 = int_to_ptr.vmem [resolvable:$true] %s503_s28 }
   0xe   :  { %563 = vmatmul.mubr.msk.f32.vlgmr.msra.gmra.mrb[0].mxu0 %vm148_vm4, %v36_v14  ;;  %v412_v22 = vld [vmem:[#allocation2] sm:$0x1]  ;;  %v282_v42 = vld [vmem:[%s810_s5 + $0x8] sm:$0xff]  ;;  %v283_v43 = vld [vmem:[%s810_s5 + $0x10] sm:$0xff]  ;;  %s625_s29 = scalar_lea.vmem %s504_s28, 16  ;;  %s629_s3 = scalar_lea.vmem %s504_s28, 32 }
   0xf   :  { %565 = vmatprep.mubr.msk.f32.mxu0 %vm148_vm4, %v37_v16  ;;  %291 = vperm.xlu0 %623, %v285_v17   ;;  %v281_v23 = vld [vmem:[%s810_s5] sm:$0xff]  ;;  %v284_v44 = vld [vmem:[%s810_s5 + $0x18] sm:$0xff]  ;;  %v420_v4 = vsub.s32 0, %v419_v3  ;;  %p626_p0 = scmp.ne.s32.totalorder %s504_s28, %s625_s29  ;;  %p630_p1 = scmp.lt.s32.totalorder %s504_s28, %s504_s28 }
  0x10   :  { %576 = vmatprep.mubr.msk.f32.mxu1 %vm309_vm5, %v281_v23  ;;  %v411_v1 = vld [vmem:[%s812_s7] sm:$0x1]  ;;  %p631_p2 = scmp.lt.s32.totalorder %s629_s3, %s625_s29 }
  0x11   :  { %296 = vperm.xlu1 %624, %v286_v19  }
  0x12   :  { %566 = vmatmul.mubr.msk.f32.gmra.mrb[2].mxu0 %vm148_vm4, %v38_v18  ;;  %p632_p3 = por %p631_p2, %p630_p1 }
  0x13   :  { %301 = vperm.xlu0 %623, %v287_v20  }
  0x14   :  { %p633_p4 = pnand %p632_p3, %p626_p0 }
  0x15   :  { %306 = vperm.xlu1 %624, %v288_v21  }
  0x17   :  { %415 = vperm.xlu0 %623, %v412_v22  }
  0x86   :  { %v256_v24 = vpop.permute.xlu0 %255 }
  0x88   :  { %v266_v25 = vpop.permute.xlu1 %265 }
  0x8a   :  { %v261_v26 = vpop.permute.xlu0 %260 }
  0x8c   :  { %v271_v32 = vpop.permute.xlu1 %270 }
  0x8e   :  { %v292_v48 = vpop.permute.xlu0 %291 }
  0x90   :  { %v297_v47 = vpop.permute.xlu1 %296 }
  0x92   :  { %v302_v57 = vpop.permute.xlu0 %301 }
  0x94   :  { %v307_v54 = vpop.permute.xlu1 %306 }
  0x96   :  { %v416_v5 = vpop.permute.xlu0 %415 }
  0x97   :  { %v421_v6 = vrot.slane %v416_v5, %v420_v4 }
  0xe1   :  { %v564_v27 = vpop.f32.mrb[0].mxu0 }
  0xe2   :  { %v274_v28 = vadd.f32 %v564_v27, %v261_v26  ;;  %v230_v29 = vpop.f32.mrb[1].mxu0 }
  0xe3   :  { %v273_v30 = vadd.f32 %v256_v24, %v230_v29 }
  0xe4   :  { %v278_v31 = vmax.f32 %v274_v28, 0.0 }
  0xe5   :  { %v277_v33 = vmax.f32 %v273_v30, 0.0  ;;  %v567_v34 = vpop.f32.mrb[2].mxu0 }
  0xe6   :  { %v276_v35 = vadd.f32 %v567_v34, %v271_v32  ;;  %v240_v36 = vpop.f32.mrb[3].mxu0 }
  0xe7   :  { %v275_v37 = vadd.f32 %v266_v25, %v240_v36  ;;  %v599_v38 = vpack.c.bf16 %v278_v31, %v277_v33 }
  0xe8   :  { %v280_v39 = vmax.f32 %v276_v35, 0.0 }
  0xe9   :  { %v279_v40 = vmax.f32 %v275_v37, 0.0  ;;  %600 = vmatprep.subr.bf16.mxu1 %v599_v38 }
  0xea   :  { %602 = vmatpush3.bf16.msra.mxu1 %v599_v38 }
  0xeb   :  { %v603_v41 = vpack.c.bf16 %v280_v39, %v279_v40 }
  0xed   :  { %604 = vmatprep.subr.bf16.mxu1 %v603_v41 }
  0xee   :  { %606 = vmatpush3.bf16.msra.mxu1 %v603_v41 }
  0xef   :  { %607 = vmatprep.subr.bf16.mxu1 %v651_v45 }
  0xf1   :  { %577 = vmatmul.mubr.msk.f32.vlgmr.msra.gmra.mrb[0].mxu1 %vm309_vm5, %v282_v42 }
  0xf2   :  { %579 = vmatprep.mubr.msk.f32.mxu1 %vm309_vm5, %v283_v43 }
  0xf5   :  { %580 = vmatmul.mubr.msk.f32.gmra.mrb[2].mxu1 %vm309_vm5, %v284_v44 }
  0xf6   :  { %590 = vmatprep.mubr.msk.f32.mxu1 %vm652_vm6, %v653_v46 }
 0x1c4   :  { %v578_v49 = vpop.f32.mrb[0].mxu1 }
 0x1c5   :  { %v394_v50 = vadd.f32 %v578_v49, %v297_v47  ;;  %v388_v51 = vpop.f32.mrb[1].mxu1 }
 0x1c6   :  { %v389_v52 = vadd.f32 %v388_v51, %v292_v48 }
 0x1c7   :  { %v408_v53 = vmax.f32 %v394_v50, 0.0 }
 0x1c8   :  { %v407_v55 = vmax.f32 %v389_v52, 0.0  ;;  %v581_v56 = vpop.f32.mrb[2].mxu1 }
 0x1c9   :  { %v404_v58 = vadd.f32 %v581_v56, %v307_v54  ;;  %v398_v59 = vpop.f32.mrb[3].mxu1 }
 0x1ca   :  { %v608_v60 = vpack.c.bf16 %v408_v53, %v407_v55  ;;  %v399_v61 = vadd.f32 %v398_v59, %v302_v57 }
 0x1cb   :  { %v410_v62 = vmax.f32 %v404_v58, 0.0 }
 0x1cc   :  { %v409_v63 = vmax.f32 %v399_v61, 0.0  ;;  %609 = vmatpush3.bf16.msra.mxu1 %v608_v60 }
 0x1cd   :  { %610 = vmatprep.subr.bf16.mxu1 %v651_v45 }
 0x1ce   :  { %v611_v0 = vpack.c.bf16 %v410_v62, %v409_v63 }
 0x1d0   :  { %612 = vmatpush3.bf16.msra.mxu1 %v611_v0 }
 0x1d3   :  { %591 = vmatmul.mubr.msk.f32.vlgmr.msra.gmra.mrb[4].mxu1 %vm309_vm5, %v411_v1 }
 0x2a6   :  { %v491_v7 = vpop.f32.mrb[4].mxu1 }
 0x2a7   :  { %v492_v8 = vadd.f32 %v491_v7, %v421_v6  ;;  %v592_v9 = vpop.f32.mrb[5].mxu1 }
 0x2a9   :  { %496 = vst.msk [vmem:[#allocation3] sm:$0x1] %vm495_vm7, %v492_v8 }
 0x2aa   :  { %636 = shalt.err (!%p633_p4)
}
 0x2ab   :  { %s637_s10 = scalar_lea.hbm %s814_s9, 16 }
 0x2ac   :  { %p638_p5 = scmp.ne.s32.totalorder %s814_s9, %s637_s10  ;;  %p641_p6 = scmp.lt.u32.totalorder %s637_s10, %s814_s9 }
 0x2ae   :  { %p643_p7 = pnand %p641_p6, %p638_p5 }
 0x2b0   :  { %646 = shalt.err (!%p643_p7)
}
 0x2b1   :  { %506 = dma.vmem_to_hbm [thread:$0]  %s504_s28, 16, %s814_s9, [#allocation4]  }
 0x2b2   :  { %647 = dma.done.wait [#allocation4], 16  }
 0x2b3   :  { %648 = vsyncadd [#allocation4], 4294967280 }
 0x2b4   :  { %510 = vsyncpa [#allocation4], 1 }

</bundles_post_ra>
